<compile_context>
chip_gen: v7x
topology: tpu7x:2x2x1
jax: 0.10.0
libtpu: 0.0.40
codegen_flags: <defaults>
</compile_context>

<pallas_src>
import functools

import jax
import jax.numpy as jnp
from jax.experimental import pallas as pl
from jax.experimental.pallas import tpu as pltpu

_BLOCK_CAP_BYTES = 4 * 1024 * 1024          # per-block target (~4 MiB)
_VMEM_LIMIT_BYTES = 32 * 1024 * 1024        # explicit scoped-VMEM budget


def _transpose_block_kernel(x_ref, o_ref):
    """x_ref: (tb, A, tT)  ->  o_ref: (tb, tT, A) via one whole-block transpose."""
    o_ref[...] = jnp.swapaxes(x_ref[...], 1, 2)


def _rotation_split(perm):
    """Decompose perm as identity-prefix + cyclic rotation of the suffix.

    Returns (p, r, m) such that perm[p + i] == p + (i + r) % m for all i,
    or None if perm has no such form.
    """
    n = len(perm)
    p = 0
    while p < n and perm[p] == p:
        p += 1
    m = n - p
    if m < 2:
        return None  # identity handled by the caller
    for r in range(1, m):
        if all(perm[p + i] == p + (i + r) % m for i in range(m)):
            return p, r, m
    return None


def _choose_tiles(b_eff, A, T, itemsize, cap_bytes=_BLOCK_CAP_BYTES):
    """Pick (tb, tT) so each block is <= ~cap_bytes and the grid has depth."""
    if T <= 128:
        tT = T                                       # full axis -> exempt from 128 rule
    else:
        per_chunk = A * 128 * itemsize               # one (1, A, 128) sliver
        max_chunks = max(1, cap_bytes // max(1, per_chunk))
        tT = 128 * max(1, min(T // 128, max_chunks, 16))   # <= 2048 lanes
        if tT >= T and T >= 256:                     # keep >= 2 steps along T
            tT = 128 * max(1, (T // 128) // 2)

    block_bytes = A * tT * itemsize
    tb = max(1, min(b_eff, cap_bytes // max(1, block_bytes)))
    # keep >= 2 total grid steps when the shape allows (v7x dual-TC split)
    if tb >= b_eff and pl.cdiv(T, tT) == 1 and b_eff >= 2:
        tb = pl.cdiv(b_eff, 2)
    return tb, tT


@functools.partial(jax.jit, static_argnames=("perm",))
def permute_pallas(x, perm):
    """Pallas equivalent of torch.Tensor.permute(*perm)."""
    perm = tuple(int(a) for a in perm)
    n = x.ndim
    if sorted(perm) != list(range(n)):
        raise ValueError(f"invalid permutation {perm} for rank-{n} input")
    if perm == tuple(range(n)):
        return x

    split = _rotation_split(perm)
    if split is None:
        # TODO(synk): general permutations (interleaving kept and moved axes)
        # need an in-kernel gather/relayout; VMamba only uses trailing-axis
        # rotations, so fall back to XLA's transpose for the rest.
        return jnp.transpose(x, perm)
    p, r, m = split

    shape = x.shape
    b_eff = 1
    for d in shape[:p]:
        b_eff *= d
    A = 1
    for d in shape[p:p + r]:          # axes that rotate to the back
        A *= d
    T = 1
    for d in shape[p + r:]:           # axes that rotate to the front of the suffix
        T *= d

    # contiguous row-major reshape: metadata-only, no HBM traffic
    x3 = x.reshape(b_eff, A, T)

    itemsize = jnp.dtype(x.dtype).itemsize
    tb, tT = _choose_tiles(b_eff, A, T, itemsize)
    grid = (pl.cdiv(b_eff, tb), pl.cdiv(T, tT))

    out3 = pl.pallas_call(
        _transpose_block_kernel,
        out_shape=jax.ShapeDtypeStruct((b_eff, T, A), x.dtype),
        grid_spec=pltpu.PrefetchScalarGridSpec(
            num_scalar_prefetch=0,
            grid=grid,
            in_specs=[pl.BlockSpec((tb, A, tT), lambda i, j: (i, 0, j))],
            out_specs=pl.BlockSpec((tb, tT, A), lambda i, j: (i, j, 0)),
        ),
        compiler_params=pltpu.CompilerParams(
            dimension_semantics=("parallel", "parallel"),
            vmem_limit_bytes=_VMEM_LIMIT_BYTES,
        ),
        cost_estimate=pl.CostEstimate(
            flops=0,
            transcendentals=0,
            bytes_accessed=2 * x.size * itemsize,
        ),
    )(x3)

    out_shape = tuple(shape[a] for a in perm)
    return out3.reshape(out_shape)    # metadata-only reshape


if __name__ == "__main__":
    key = jax.random.PRNGKey(0)

    # NCHW activation, as fed to Permute(0, 2, 3, 1) in VMamba.
    B, C, H, W = 2, 4, 16, 16
    x = jax.random.normal(key, (B, C, H, W), dtype=jnp.float32)

    perm = (0, 2, 3, 1)                       # NCHW -> NHWC
    y = permute_pallas(x, perm=perm)
    jax.block_until_ready(y)

    y_ref = jnp.transpose(x, perm)
    assert y.shape == y_ref.shape, (y.shape, y_ref.shape)
    assert bool(jnp.array_equal(y, y_ref)), "mismatch vs jnp.transpose reference"

    # Inverse direction also used in VMamba: NHWC -> NCHW (round trip check).
    z = permute_pallas(y, perm=(0, 3, 1, 2))
    jax.block_until_ready(z)
    assert bool(jnp.array_equal(z, x)), "round-trip mismatch"

    # Ragged-T case (T = 24*24 = 576 not a multiple of the 512-lane tile):
    # exercises the cdiv grid + masked edge-block path.
    x2 = jax.random.normal(jax.random.PRNGKey(1), (2, 4, 24, 24), dtype=jnp.float32)
    y2 = permute_pallas(x2, perm=(0, 2, 3, 1))
    jax.block_until_ready(y2)
    assert bool(jnp.array_equal(y2, jnp.transpose(x2, (0, 2, 3, 1)))), "ragged-T mismatch"

    print("KERNEL_OK")
</pallas_src>

<mosaic_0001>
module attributes {stable_mosaic.version = 11 : i64} {
  func.func @_transpose_block_kernel(%arg0: i32, %arg1: i32, %arg2: memref<2x4x128xf32, #tpu.memory_space<vmem>>, %arg3: memref<2x128x4xf32, #tpu.memory_space<vmem>>) attributes {dimension_semantics = [#tpu.dimension_semantics<parallel>, #tpu.dimension_semantics<parallel>], iteration_bounds = array<i64: 1, 2>, scalar_prefetch = 0 : i64, scratch_operands = 0 : i64, tpu.core_type = #tpu.core_type<tc>, window_params = [{transform_indices = @transform_0, window_bounds = array<i64: 2, 4, 128>}, {transform_indices = @transform_1, window_bounds = array<i64: 2, 128, 4>}]} {
    %c0 = arith.constant 0 : index
    %c0_0 = arith.constant 0 : index
    %c0_1 = arith.constant 0 : index
    %0 = vector.load %arg2[%c0, %c0_0, %c0_1] : memref<2x4x128xf32, #tpu.memory_space<vmem>>, vector<2x4x128xf32>
    %1 = tpu.transpose %0, [0, 2, 1] : vector<2x4x128xf32> -> vector<2x128x4xf32>
    %c0_2 = arith.constant 0 : index
    %c0_3 = arith.constant 0 : index
    %c0_4 = arith.constant 0 : index
    %2 = vector.load %arg3[%c0_2, %c0_3, %c0_4] : memref<2x128x4xf32, #tpu.memory_space<vmem>>, vector<2x128x4xf32>
    tpu.vector_store %arg3[%c0_2, %c0_3, %c0_4], %1 {strides = array<i32>} : memref<2x128x4xf32, #tpu.memory_space<vmem>>, vector<2x128x4xf32>,
    return
  }
  func.func @transform_0(%arg0: i32, %arg1: i32) -> (i32, i32, i32) {
    %c0_i32 = arith.constant 0 : i32
    %c0_i32_0 = arith.constant 0 : i32
    return %arg0, %c0_i32, %arg1 : i32, i32, i32
  }
  func.func @transform_1(%arg0: i32, %arg1: i32) -> (i32, i32, i32) {
    %c0_i32 = arith.constant 0 : i32
    %c0_i32_0 = arith.constant 0 : i32
    return %arg0, %arg1, %c0_i32 : i32, i32, i32
  }
}

</mosaic_0001>

<bundles_post_ra>
// kernel: permute_pallas.1
= control target key start
LH: loop header
LB: loop body
LE: loop exit
PB: predicated region body
PF: predicated region fallthrough
CT: control target
= control target key end

     0   :  { %s622_s6 = smov 0   ;;  %s624_s7 = smov 0   ;;  %s826_s0 = inlined_call_operand.vmem [shape: f32[2,4,256], index: 0, kind: input, shape index: {}]   ;;  %s827_s1 = inlined_call_operand.vmem [shape: f32[2,256,4], index: 1, kind: output, shape index: {}]  }
   0x1   :  { %s626_s8 = smov 0   ;;  %s628_s9 = smov 0  }
   0x2   :  { %s630_s10 = smov 0  }
   0x3 LB: > { %s20_s11 = sadd.s32 1, %s606_s9  ;;  %s516_s12 = sadd.s32 4294967295, %s610_s10   ;;  %s610_s10 = sphi %s630_s10, %s11_s10   ;;  %s606_s9 = sphi %s628_s9, %s832_s9   ;;  %s602_s8 = sphi %s626_s8, %s831_s8   ;;  %s598_s7 = sphi %s624_s7, %s830_s7   ;;  %s594_s6 = sphi %s622_s6, %s829_s6  }
   0x4   : > { %p21_p0 = scmp.ge.s32.totalorder %s20_s11, 2  ;;  %p39_p1 = scmp.ne.s32.totalorder %s598_s7, %s594_s6 }
   0x5   : > { %p40_p2 = scmp.eq.s32.totalorder %s610_s10, 0  ;;  %p71_p4 = scmp.eq.s32.totalorder %s516_s12, 1 }
   0x6   : > { %s834_s11 = smov (%p21_p0, %s20_s11), 0  ;;  %s32_s14 = sadd.s32 1, %s598_s7 }
   0x7   : > { %p41_p3 = por %p40_p2, %p39_p1  ;;  %s28_s13 = ssub.s32 %s606_s9, %s834_s11 }
   0x8   : > { %p30_p5 = scmp.eq.s32.totalorder %s28_s13, 0  ;;  %p657_p6 = por %p71_p4, %p39_p1 }
   0x9   : > { %p519_p7 = scmp.ge.s32.totalorder %s610_s10, 2 }
   0xa   : > { %s662_s16 = scalar_select %p30_p5, %s598_s7, %s32_s14  }
   0xb   : > { %93 = sbr.rel (%p519_p7) target bundleno = 25 (0x19), region = 16 }
  0x12   : > { %96 = sbr.rel (!%p41_p3) target bundleno = 25 (0x19), region = 20  ;;  %s98_s17 = sand.u32 (%p41_p3), 1, %s598_s7  }
  0x13   : > { %s521_s18 = sshll.u32 (%p41_p3), %s606_s9, 2  ;;  %s520_s19 = sshll.u32 (%p41_p3), %s98_s17, 3 }
  0x14   : > { %s105_s22 = scalar_lea.vmem (%p41_p3), %s826_s0, %s521_s18  ;;  %s100_s23 = scalar_lea.vmem (%p41_p3), [#allocation2], %s520_s19 }
  0x15   : > { %v121_v0 = vld [vmem:[%s105_s22] sm:$0xf] (%p41_p3)  ;;  %v123_v1 = vld [vmem:[%s105_s22 + $0x8] sm:$0xf] (%p41_p3) }
  0x16   : > { %122 = vst [vmem:[%s100_s23] sm:$0xf] (%p41_p3), %v121_v0  ;;  %124 = vst [vmem:[%s100_s23 + $0x4] sm:$0xf] (%p41_p3), %v123_v1 }
  0x19 PF: > { %p522_p8 = scmp.ge.s32.totalorder %s610_s10, 1  ;;  %p150_p9 = scmp.lt.s32.totalorder %s610_s10, 3 }
  0x1b   : > { %p151_p10 = pnand %p522_p8, %p150_p9 }
  0x1c   : > { %s157_s24 = sand.u32 (!%p151_p10), 1, %s594_s6   ;;  %vm244_vm0 = vcmask (!%p151_p10), 31744  }
  0x1d   : > { %154 = sbr.rel (%p151_p10) target bundleno = 294 (0x126), region = 61  ;;  %s523_s25 = sshll.u32 (!%p151_p10), %s157_s24, 3 }
  0x1e   : > { %s159_s26 = scalar_lea.vmem (!%p151_p10), [#allocation2], %s523_s25  ;;  %s524_s27 = sshll.u32 (!%p151_p10), %s157_s24, 8 }
  0x1f   : > { %v178_v2 = vld [vmem:[%s159_s26] sm:$0xf] (!%p151_p10)  ;;  %v179_v3 = vld [vmem:[%s159_s26 + $0x4] sm:$0xf] (!%p151_p10)  ;;  %s673_s28 = scalar_lea.vmem (!%p151_p10), [#allocation3], %s524_s27 }
  0x20   : > { %180 = vxpose.xlu0.b32.start.end [1/1] (short) (!%p151_p10), %v178_v2, 128 }
  0x24   : > { %s530_s29 = sshll.u32 (%p657_p6), %s602_s8, 7 }
  0x25   : > { %s748_s3 = scalar_lea.vmem (%p657_p6), %s827_s1, %s530_s29 }
  0x5d   : > { %212 = vxpose.xlu0.b32.start.end [1/1] (short) %v179_v3, 128 }
  0xa0   : > { %v196_v4 = vpop.trf.xlu0 }
  0xa1   : > { %245 = vst.msk [vmem:[%s673_s28] sm:$0xff] %vm244_vm0, %v196_v4 }
  0xa4   : > { %v197_v5 = vpop.trf.xlu0 }
  0xa5   : > { %246 = vst.msk [vmem:[%s673_s28 + $0x8] sm:$0xff] %vm244_vm0, %v197_v5 }
  0xa8   : > { %v198_v6 = vpop.trf.xlu0  ;;  %v379_v36 = vld [vmem:[%s673_s28] sm:$0xff] (%p657_p6) }
  0xa9   : > { %247 = vst.msk [vmem:[%s673_s28 + $0x10] sm:$0xff] %vm244_vm0, %v198_v6  ;;  %380 = vst [vmem:[%s748_s3] sm:$0xff] (%p657_p6), %v379_v36 }
  0xac   : > { %v199_v7 = vpop.trf.xlu0  ;;  %v381_v37 = vld [vmem:[%s673_s28 + $0x8] sm:$0xff] (%p657_p6) }
  0xad   : > { %248 = vst.msk [vmem:[%s673_s28 + $0x18] sm:$0xff] %vm244_vm0, %v199_v7  ;;  %382 = vst [vmem:[%s748_s3 + $0x8] sm:$0xff] (%p657_p6), %v381_v37 }
  0xb0   : > { %v200_v8 = vpop.trf.xlu0  ;;  %v383_v38 = vld [vmem:[%s673_s28 + $0x10] sm:$0xff] (%p657_p6) }
  0xb1   : > { %249 = vst.msk [vmem:[%s673_s28 + $0x20] sm:$0xff] %vm244_vm0, %v200_v8  ;;  %384 = vst [vmem:[%s748_s3 + $0x10] sm:$0xff] (%p657_p6), %v383_v38 }
  0xb4   : > { %v201_v9 = vpop.trf.xlu0  ;;  %v385_v39 = vld [vmem:[%s673_s28 + $0x18] sm:$0xff] (%p657_p6) }
  0xb5   : > { %250 = vst.msk [vmem:[%s673_s28 + $0x28] sm:$0xff] %vm244_vm0, %v201_v9  ;;  %386 = vst [vmem:[%s748_s3 + $0x18] sm:$0xff] (%p657_p6), %v385_v39 }
  0xb8   : > { %v202_v10 = vpop.trf.xlu0  ;;  %v387_v40 = vld [vmem:[%s673_s28 + $0x20] sm:$0xff] (%p657_p6) }
  0xb9   : > { %251 = vst.msk [vmem:[%s673_s28 + $0x30] sm:$0xff] %vm244_vm0, %v202_v10  ;;  %388 = vst [vmem:[%s748_s3 + $0x20] sm:$0xff] (%p657_p6), %v387_v40 }
  0xbc   : > { %v203_v11 = vpop.trf.xlu0  ;;  %v389_v41 = vld [vmem:[%s673_s28 + $0x28] sm:$0xff] (%p657_p6) }
  0xbd   : > { %252 = vst.msk [vmem:[%s673_s28 + $0x38] sm:$0xff] %vm244_vm0, %v203_v11  ;;  %390 = vst [vmem:[%s748_s3 + $0x28] sm:$0xff] (%p657_p6), %v389_v41 }
  0xc0   : > { %v204_v12 = vpop.trf.xlu0  ;;  %v391_v42 = vld [vmem:[%s673_s28 + $0x30] sm:$0xff] (%p657_p6) }
  0xc1   : > { %253 = vst.msk [vmem:[%s673_s28 + $0x40] sm:$0xff] %vm244_vm0, %v204_v12  ;;  %392 = vst [vmem:[%s748_s3 + $0x30] sm:$0xff] (%p657_p6), %v391_v42 }
  0xc4   : > { %v205_v13 = vpop.trf.xlu0  ;;  %v393_v43 = vld [vmem:[%s673_s28 + $0x38] sm:$0xff] (%p657_p6) }
  0xc5   : > { %254 = vst.msk [vmem:[%s673_s28 + $0x48] sm:$0xff] %vm244_vm0, %v205_v13  ;;  %394 = vst [vmem:[%s748_s3 + $0x38] sm:$0xff] (%p657_p6), %v393_v43 }
  0xc8   : > { %v206_v14 = vpop.trf.xlu0  ;;  %v395_v44 = vld [vmem:[%s673_s28 + $0x40] sm:$0xff] (%p657_p6) }
  0xc9   : > { %255 = vst.msk [vmem:[%s673_s28 + $0x50] sm:$0xff] %vm244_vm0, %v206_v14  ;;  %396 = vst [vmem:[%s748_s3 + $0x40] sm:$0xff] (%p657_p6), %v395_v44 }
  0xcc   : > { %v207_v15 = vpop.trf.xlu0  ;;  %v397_v45 = vld [vmem:[%s673_s28 + $0x48] sm:$0xff] (%p657_p6) }
  0xcd   : > { %256 = vst.msk [vmem:[%s673_s28 + $0x58] sm:$0xff] %vm244_vm0, %v207_v15  ;;  %398 = vst [vmem:[%s748_s3 + $0x48] sm:$0xff] (%p657_p6), %v397_v45 }
  0xd0   : > { %v208_v16 = vpop.trf.xlu0  ;;  %v399_v46 = vld [vmem:[%s673_s28 + $0x50] sm:$0xff] (%p657_p6) }
  0xd1   : > { %257 = vst.msk [vmem:[%s673_s28 + $0x60] sm:$0xff] %vm244_vm0, %v208_v16  ;;  %400 = vst [vmem:[%s748_s3 + $0x50] sm:$0xff] (%p657_p6), %v399_v46 }
  0xd4   : > { %v209_v17 = vpop.trf.xlu0  ;;  %v401_v47 = vld [vmem:[%s673_s28 + $0x58] sm:$0xff] (%p657_p6) }
  0xd5   : > { %258 = vst.msk [vmem:[%s673_s28 + $0x68] sm:$0xff] %vm244_vm0, %v209_v17  ;;  %402 = vst [vmem:[%s748_s3 + $0x58] sm:$0xff] (%p657_p6), %v401_v47 }
  0xd8   : > { %v210_v18 = vpop.trf.xlu0  ;;  %v403_v48 = vld [vmem:[%s673_s28 + $0x60] sm:$0xff] (%p657_p6) }
  0xd9   : > { %259 = vst.msk [vmem:[%s673_s28 + $0x70] sm:$0xff] %vm244_vm0, %v210_v18  ;;  %404 = vst [vmem:[%s748_s3 + $0x60] sm:$0xff] (%p657_p6), %v403_v48 }
  0xdc   : > { %v211_v19 = vpop.trf.xlu0  ;;  %v405_v49 = vld [vmem:[%s673_s28 + $0x68] sm:$0xff] (%p657_p6) }
  0xdd   : > { %260 = vst.msk [vmem:[%s673_s28 + $0x78] sm:$0xff] %vm244_vm0, %v211_v19  ;;  %406 = vst [vmem:[%s748_s3 + $0x68] sm:$0xff] (%p657_p6), %v405_v49 }
  0xe0   : > { %v228_v20 = vpop.trf.xlu0  ;;  %v407_v50 = vld [vmem:[%s673_s28 + $0x70] sm:$0xff] (%p657_p6) }
  0xe1   : > { %261 = vst.msk [vmem:[%s673_s28 + $0x80] sm:$0xff] %vm244_vm0, %v228_v20  ;;  %408 = vst [vmem:[%s748_s3 + $0x70] sm:$0xff] (%p657_p6), %v407_v50 }
  0xe4   : > { %v229_v21 = vpop.trf.xlu0  ;;  %v409_v51 = vld [vmem:[%s673_s28 + $0x78] sm:$0xff] (%p657_p6) }
  0xe5   : > { %262 = vst.msk [vmem:[%s673_s28 + $0x88] sm:$0xff] %vm244_vm0, %v229_v21  ;;  %410 = vst [vmem:[%s748_s3 + $0x78] sm:$0xff] (%p657_p6), %v409_v51 }
  0xe8   : > { %v230_v22 = vpop.trf.xlu0  ;;  %v411_v52 = vld [vmem:[%s673_s28 + $0x80] sm:$0xff] (%p657_p6) }
  0xe9   : > { %263 = vst.msk [vmem:[%s673_s28 + $0x90] sm:$0xff] %vm244_vm0, %v230_v22  ;;  %412 = vst [vmem:[%s748_s3 + $0x100] sm:$0xff] (%p657_p6), %v411_v52 }
  0xec   : > { %v231_v23 = vpop.trf.xlu0  ;;  %v413_v53 = vld [vmem:[%s673_s28 + $0x88] sm:$0xff] (%p657_p6) }
  0xed   : > { %264 = vst.msk [vmem:[%s673_s28 + $0x98] sm:$0xff] %vm244_vm0, %v231_v23  ;;  %414 = vst [vmem:[%s748_s3 + $0x108] sm:$0xff] (%p657_p6), %v413_v53 }
  0xf0   : > { %v232_v24 = vpop.trf.xlu0  ;;  %v415_v54 = vld [vmem:[%s673_s28 + $0x90] sm:$0xff] (%p657_p6) }
  0xf1   : > { %265 = vst.msk [vmem:[%s673_s28 + $0xa0] sm:$0xff] %vm244_vm0, %v232_v24  ;;  %416 = vst [vmem:[%s748_s3 + $0x110] sm:$0xff] (%p657_p6), %v415_v54 }
  0xf4   : > { %v233_v25 = vpop.trf.xlu0  ;;  %v417_v55 = vld [vmem:[%s673_s28 + $0x98] sm:$0xff] (%p657_p6) }
  0xf5   : > { %266 = vst.msk [vmem:[%s673_s28 + $0xa8] sm:$0xff] %vm244_vm0, %v233_v25  ;;  %418 = vst [vmem:[%s748_s3 + $0x118] sm:$0xff] (%p657_p6), %v417_v55 }
  0xf8   : > { %v234_v26 = vpop.trf.xlu0  ;;  %v419_v56 = vld [vmem:[%s673_s28 + $0xa0] sm:$0xff] (%p657_p6) }
  0xf9   : > { %267 = vst.msk [vmem:[%s673_s28 + $0xb0] sm:$0xff] %vm244_vm0, %v234_v26  ;;  %420 = vst [vmem:[%s748_s3 + $0x120] sm:$0xff] (%p657_p6), %v419_v56 }
  0xfc   : > { %v235_v27 = vpop.trf.xlu0  ;;  %v421_v57 = vld [vmem:[%s673_s28 + $0xa8] sm:$0xff] (%p657_p6) }
  0xfd   : > { %268 = vst.msk [vmem:[%s673_s28 + $0xb8] sm:$0xff] %vm244_vm0, %v235_v27  ;;  %422 = vst [vmem:[%s748_s3 + $0x128] sm:$0xff] (%p657_p6), %v421_v57 }
 0x100   : > { %v236_v28 = vpop.trf.xlu0  ;;  %v423_v58 = vld [vmem:[%s673_s28 + $0xb0] sm:$0xff] (%p657_p6) }
 0x101   : > { %269 = vst.msk [vmem:[%s673_s28 + $0xc0] sm:$0xff] %vm244_vm0, %v236_v28  ;;  %424 = vst [vmem:[%s748_s3 + $0x130] sm:$0xff] (%p657_p6), %v423_v58 }
 0x104   : > { %v237_v29 = vpop.trf.xlu0  ;;  %v425_v59 = vld [vmem:[%s673_s28 + $0xb8] sm:$0xff] (%p657_p6) }
 0x105   : > { %270 = vst.msk [vmem:[%s673_s28 + $0xc8] sm:$0xff] %vm244_vm0, %v237_v29  ;;  %426 = vst [vmem:[%s748_s3 + $0x138] sm:$0xff] (%p657_p6), %v425_v59 }
 0x108   : > { %v238_v30 = vpop.trf.xlu0  ;;  %v427_v60 = vld [vmem:[%s673_s28 + $0xc0] sm:$0xff] (%p657_p6) }
 0x109   : > { %271 = vst.msk [vmem:[%s673_s28 + $0xd0] sm:$0xff] %vm244_vm0, %v238_v30  ;;  %428 = vst [vmem:[%s748_s3 + $0x140] sm:$0xff] (%p657_p6), %v427_v60 }
 0x10c   : > { %v239_v31 = vpop.trf.xlu0  ;;  %v429_v61 = vld [vmem:[%s673_s28 + $0xc8] sm:$0xff] (%p657_p6) }
 0x10d   : > { %272 = vst.msk [vmem:[%s673_s28 + $0xd8] sm:$0xff] %vm244_vm0, %v239_v31  ;;  %430 = vst [vmem:[%s748_s3 + $0x148] sm:$0xff] (%p657_p6), %v429_v61 }
 0x110   : > { %v240_v32 = vpop.trf.xlu0  ;;  %v431_v62 = vld [vmem:[%s673_s28 + $0xd0] sm:$0xff] (%p657_p6) }
 0x111   : > { %273 = vst.msk [vmem:[%s673_s28 + $0xe0] sm:$0xff] %vm244_vm0, %v240_v32  ;;  %432 = vst [vmem:[%s748_s3 + $0x150] sm:$0xff] (%p657_p6), %v431_v62 }
 0x114   : > { %v241_v33 = vpop.trf.xlu0  ;;  %v433_v63 = vld [vmem:[%s673_s28 + $0xd8] sm:$0xff] (%p657_p6) }
 0x115   : > { %274 = vst.msk [vmem:[%s673_s28 + $0xe8] sm:$0xff] %vm244_vm0, %v241_v33  ;;  %434 = vst [vmem:[%s748_s3 + $0x158] sm:$0xff] (%p657_p6), %v433_v63 }
 0x117   : > { %283 = sbr.rel (!%p657_p6) target bundleno = 294 (0x126), region = 69 }
 0x118   : > { %v242_v34 = vpop.trf.xlu0  ;;  %v435_v0 = vld [vmem:[%s673_s28 + $0xe0] sm:$0xff] (%p657_p6) }
 0x119   : > { %275 = vst.msk [vmem:[%s673_s28 + $0xf0] sm:$0xff] %vm244_vm0, %v242_v34  ;;  %436 = vst [vmem:[%s748_s3 + $0x160] sm:$0xff] (%p657_p6), %v435_v0 }
 0x11c   : > { %v243_v35 = vpop.trf.xlu0  ;;  %v437_v1 = vld [vmem:[%s673_s28 + $0xe8] sm:$0xff] (%p657_p6) }
 0x11d   : > { %276 = vst.msk [vmem:[%s673_s28 + $0xf8] sm:$0xff] %vm244_vm0, %v243_v35  ;;  %438 = vst [vmem:[%s748_s3 + $0x168] sm:$0xff] (%p657_p6), %v437_v1 }
 0x120   : > { %v439_v2 = vld [vmem:[%s673_s28 + $0xf0] sm:$0xff] }
 0x121   : > { %440 = vst [vmem:[%s748_s3 + $0x170] sm:$0xff] %v439_v2 }
 0x124   : > { %v441_v3 = vld [vmem:[%s673_s28 + $0xf8] sm:$0xff] }
 0x125   : > { %442 = vst [vmem:[%s748_s3 + $0x178] sm:$0xff] %v441_v3 }
 0x126 PF: > { %s11_s10 = sadd.s32 1, %s610_s10   ;;  %s829_s6 = smov %s598_s7 }
 0x127   : > { %p8_p11 = scmp.ge.s32.totalorder %s11_s10, 4   ;;  %s830_s7 = smov %s662_s16 }
 0x128   : > { %s831_s8 = smov %s606_s9  ;;  %s832_s9 = smov %s834_s11 }
 0x129   :  { %10 = sbr.rel (!%p8_p11) target bundleno = 3 (0x3), region = 138 }

</bundles_post_ra>
